<compile_context>
chip_gen: v7x
topology: tpu7x:2x2x1
jax: 0.10.0
libtpu: 0.0.40
codegen_flags: <defaults>
</compile_context>

<pallas_src>
import jax
import jax.numpy as jnp
from jax.experimental import pallas as pl
from jax.experimental.pallas import tpu as pltpu

EMBED = 128
HIDDEN = 64


def encoder_kernel(tok_ref, proj_ref, whh_f_ref, out_ref):
    """Fused one-hot embedding/projection gather + bi-LSTM tail, emitting lstm_out[-1].

    tok_ref   : (T*B, 1) int32 token ids (VMEM column; time-major, batch fastest).
    proj_ref  : (V, 8H) f32 = E @ [W_ih_fwd^T | W_ih_bwd^T] + (b_ih + b_hh),
                gate columns permuted to (i, f, o, g) per direction.
    whh_f_ref : (H, 4H) f32 forward recurrent weights, permuted (i, f, o, g).
    out_ref   : (B, 2H) f32 = [h_fwd(T-1) | h_bwd(T-1)].
    """
    H = HIDDEN
    TB = tok_ref.shape[0]
    V = proj_ref.shape[0]
    B = out_ref.shape[0]
    T = TB // B

    # 1) One MXU op replaces the per-token gather AND the input projection:
    #    one_hot(tokens) @ proj  (bias already folded into proj rows).
    tok = tok_ref[...]                                              # (TB, 1) int32
    col = jax.lax.broadcasted_iota(jnp.int32, (TB, V), 1)           # (TB, V)
    onehot = (tok == col).astype(jnp.float32)                       # (TB, V)
    gx = jnp.dot(onehot, proj_ref[...],
                 preferred_element_type=jnp.float32)                # (TB, 8H)

    whh_f = whh_f_ref[...]

    # Hoisted static lane mask: lanes [0, 3H) -> sigmoid (i, f, o), [3H, 4H) -> tanh (g).
    lane = jax.lax.broadcasted_iota(jnp.int32, (B, 4 * H), 1)
    sig_mask = lane < 3 * H

    def activate(gates):
        # Full-width transcendentals (EUP slot has slack) + one hoisted-mask select,
        # instead of sub-vreg 192/64-lane transcendental slices on the serial path.
        act = jnp.where(sig_mask, jax.nn.sigmoid(gates), jnp.tanh(gates))
        return act[:, :H], act[:, H:2 * H], act[:, 2 * H:3 * H], act[:, 3 * H:]

    # 2) Forward recurrence, fully unrolled.  t=0 peeled: h=c=0 -> no recurrent dot.
    i0, _f0, o0, g0 = activate(gx[0:B, :4 * H])
    c = i0 * g0
    h = o0 * jnp.tanh(c)
    for t in range(1, T):
        gates = gx[t * B:(t + 1) * B, :4 * H] + jnp.dot(
            h, whh_f, preferred_element_type=jnp.float32)
        i, f, o, g = activate(gates)
        c = f * c + i * g
        h = o * jnp.tanh(c)

    # 3) Backward-direction output at the LAST timestep: zero state, so the
    #    whh_b matmul is identically zero -> just activate the gx slice.
    ib, _fb, ob, gb = activate(gx[(T - 1) * B:T * B, 4 * H:])
    cb = ib * gb
    hb = ob * jnp.tanh(cb)

    # 4) One lane-dense (B, 128) store.
    out_ref[...] = jnp.concatenate([h, hb], axis=-1)


def init_params(key, vocab_size):
    """Deterministic synthetic parameters with the same shapes as the PyTorch module."""
    ks = jax.random.split(key, 9)
    k = 1.0 / jnp.sqrt(HIDDEN)  # PyTorch LSTM init range
    u = lambda kk, shape: jax.random.uniform(kk, shape, jnp.float32, -k, k)
    return {
        "embedding": jax.random.normal(ks[0], (vocab_size, EMBED), jnp.float32),
        # forward direction (l0)
        "w_ih_f": u(ks[1], (4 * HIDDEN, EMBED)),
        "w_hh_f": u(ks[2], (4 * HIDDEN, HIDDEN)),
        "b_ih_f": u(ks[3], (4 * HIDDEN,)),
        "b_hh_f": u(ks[4], (4 * HIDDEN,)),
        # backward direction (l0_reverse)
        "w_ih_b": u(ks[5], (4 * HIDDEN, EMBED)),
        "w_hh_b": u(ks[6], (4 * HIDDEN, HIDDEN)),
        "b_ih_b": u(ks[7], (4 * HIDDEN,)),
        "b_hh_b": u(ks[8], (4 * HIDDEN,)),
    }


def prepare_params(params):
    """One-time, out-of-hot-path conversion to kernel layout (E@W fold included)."""
    H = HIDDEN

    def perm(w):  # PyTorch gate blocks (i, f, g, o) along axis 0 -> (i, f, o, g)
        return jnp.concatenate([w[:2 * H], w[3 * H:4 * H], w[2 * H:3 * H]], axis=0)

    w_all = jnp.concatenate([perm(params["w_ih_f"]).T,
                             perm(params["w_ih_b"]).T], axis=1)          # (EMBED, 8H)
    b_all = jnp.concatenate([perm(params["b_ih_f"] + params["b_hh_f"]),
                             perm(params["b_ih_b"] + params["b_hh_b"])])  # (8H,)
    # Offline embedding @ input-projection fold (review opt 3a).
    proj = params["embedding"] @ w_all + b_all                            # (V, 8H)
    return {
        "proj": proj,
        "whh_f": perm(params["w_hh_f"]).T,                                # (H, 4H)
        # NOTE: whh_b / b_* are intentionally absent: only lstm_out[-1] is consumed
        # and the backward step at T-1 starts from the zero state.
    }


@jax.jit
def encoder_forward(tokens, kp):
    """tokens: (T, B) int32. Returns lstm_out[-1].view(-1) -> (B * 2*HIDDEN,)."""
    T, B = tokens.shape
    tok_col = tokens.reshape(T * B, 1)                                    # time-major, batch fastest
    vmem = pl.BlockSpec(memory_space=pltpu.MemorySpace.VMEM)
    out = pl.pallas_call(
        encoder_kernel,
        out_shape=jax.ShapeDtypeStruct((B, 2 * HIDDEN), jnp.float32),
        in_specs=[vmem, vmem, vmem],
        out_specs=vmem,
    )(tok_col, kp["proj"], kp["whh_f"])
    # torch: lstm_out[-1].view(-1)  ->  per-batch [fwd(64) | bwd(64)] flattened
    return out.reshape(-1)


def reference_forward(tokens, params):
    """Pure-JAX reference with full torch.nn.LSTM(bidirectional=True) semantics."""
    H = HIDDEN
    emb = params["embedding"][tokens]                                     # (T, B, EMBED)
    T, B, _ = emb.shape

    def run(xs, w_ih, w_hh, b_ih, b_hh):
        def cell(x_t, h, c):
            gates = x_t @ w_ih.T + h @ w_hh.T + b_ih + b_hh               # (B, 4H) i,f,g,o
            i = jax.nn.sigmoid(gates[:, :H])
            f = jax.nn.sigmoid(gates[:, H:2 * H])
            g = jnp.tanh(gates[:, 2 * H:3 * H])
            o = jax.nn.sigmoid(gates[:, 3 * H:])
            c = f * c + i * g
            return o * jnp.tanh(c), c

        h = c = jnp.zeros((B, H), jnp.float32)
        outs = []
        for t in range(xs.shape[0]):
            h, c = cell(xs[t], h, c)
            outs.append(h)
        return jnp.stack(outs)                                            # (T, B, H)

    out_f = run(emb, params["w_ih_f"], params["w_hh_f"],
                params["b_ih_f"], params["b_hh_f"])
    out_b = run(emb[::-1], params["w_ih_b"], params["w_hh_b"],
                params["b_ih_b"], params["b_hh_b"])[::-1]
    lstm_out = jnp.concatenate([out_f, out_b], axis=-1)                   # (T, B, 2H)
    return lstm_out[-1].reshape(-1)


if __name__ == "__main__":
    vocab_size = 32   # module's vocab dict is empty; use a small synthetic vocab
    T, B = 8, 2       # (seq_len, batch), time-first like default nn.LSTM

    key = jax.random.PRNGKey(0)
    k_params, k_tok = jax.random.split(key)
    params = init_params(k_params, vocab_size)
    kernel_params = prepare_params(params)
    tokens = jax.random.randint(k_tok, (T, B), 0, vocab_size, dtype=jnp.int32)

    out = encoder_forward(tokens, kernel_params)
    jax.block_until_ready(out)
    assert out.shape == (B * 2 * HIDDEN,), out.shape

    ref = reference_forward(tokens, params)
    assert jnp.max(jnp.abs(out - ref)) < 1e-4, float(jnp.max(jnp.abs(out - ref)))

    print("KERNEL_OK")
</pallas_src>

<mosaic_0001>
module attributes {stable_mosaic.version = 11 : i64} {
  func.func @encoder_kernel(%arg0: memref<16x1xi32, #tpu.memory_space<vmem>>, %arg1: memref<32x512xf32, #tpu.memory_space<vmem>>, %arg2: memref<64x256xf32, #tpu.memory_space<vmem>>, %arg3: memref<2x128xf32, #tpu.memory_space<vmem>>) attributes {dimension_semantics = [], scalar_prefetch = 0 : i64, scratch_operands = 0 : i64, tpu.core_type = #tpu.core_type<tc>} {
    %c0 = arith.constant 0 : index
    %c0_0 = arith.constant 0 : index
    %0 = vector.load %arg0[%c0, %c0_0] : memref<16x1xi32, #tpu.memory_space<vmem>>, vector<16x1xi32>
    %1 = tpu.iota {dimensions = array<i32: 1>} : vector<16x32xi32>
    %2 = vector.broadcast %0 : vector<16x1xi32> to vector<16x32xi32>
    %3 = arith.cmpi eq, %2, %1 : vector<16x32xi32>
    %4 = arith.extui %3 : vector<16x32xi1> to vector<16x32xi32>
    %5 = arith.sitofp %4 : vector<16x32xi32> to vector<16x32xf32>
    %c0_1 = arith.constant 0 : index
    %c0_2 = arith.constant 0 : index
    %6 = vector.load %arg1[%c0_1, %c0_2] : memref<32x512xf32, #tpu.memory_space<vmem>>, vector<32x512xf32>
    %cst = arith.constant dense<0.000000e+00> : vector<16x512xf32>
    %7 = tpu.matmul %5, %6, %cst {dimension_numbers = #tpu.dot_dimension_numbers<[1], [0], [0], [1], [0, 0, 1, 1], [], []>} : vector<16x32xf32>, vector<32x512xf32>, vector<16x512xf32> -> vector<16x512xf32>
    %c0_3 = arith.constant 0 : index
    %c0_4 = arith.constant 0 : index
    %8 = vector.load %arg2[%c0_3, %c0_4] : memref<64x256xf32, #tpu.memory_space<vmem>>, vector<64x256xf32>
    %9 = tpu.iota {dimensions = array<i32: 1>} : vector<2x256xi32>
    %c192_i32 = arith.constant 192 : i32
    %10 = vector.broadcast %c192_i32 : i32 to vector<2x256xi32>
    %11 = arith.cmpi slt, %9, %10 : vector<2x256xi32>
    %12 = vector.extract_strided_slice %7 {offsets = [0, 0], sizes = [2, 256], strides = [1, 1]} : vector<16x512xf32> to vector<2x256xf32>
    %13 = arith.negf %12 : vector<2x256xf32>
    %14 = math.exp %13 : vector<2x256xf32>
    %cst_5 = arith.constant 1.000000e+00 : f32
    %15 = vector.broadcast %cst_5 : f32 to vector<2x256xf32>
    %16 = arith.addf %15, %14 : vector<2x256xf32>
    %17 = arith.divf %15, %16 : vector<2x256xf32>
    %18 = math.tanh %12 : vector<2x256xf32>
    %19 = arith.select %11, %17, %18 : vector<2x256xi1>, vector<2x256xf32>
    %20 = vector.extract_strided_slice %19 {offsets = [0, 0], sizes = [2, 64], strides = [1, 1]} : vector<2x256xf32> to vector<2x64xf32>
    %21 = vector.extract_strided_slice %19 {offsets = [0, 128], sizes = [2, 64], strides = [1, 1]} : vector<2x256xf32> to vector<2x64xf32>
    %22 = vector.extract_strided_slice %19 {offsets = [0, 192], sizes = [2, 64], strides = [1, 1]} : vector<2x256xf32> to vector<2x64xf32>
    %23 = arith.mulf %20, %22 : vector<2x64xf32>
    %24 = math.tanh %23 : vector<2x64xf32>
    %25 = arith.mulf %21, %24 : vector<2x64xf32>
    %26 = vector.extract_strided_slice %7 {offsets = [2, 0], sizes = [2, 256], strides = [1, 1]} : vector<16x512xf32> to vector<2x256xf32>
    %cst_6 = arith.constant dense<0.000000e+00> : vector<2x256xf32>
    %27 = tpu.matmul %25, %8, %cst_6 {dimension_numbers = #tpu.dot_dimension_numbers<[1], [0], [0], [1], [0, 0, 1, 1], [], []>} : vector<2x64xf32>, vector<64x256xf32>, vector<2x256xf32> -> vector<2x256xf32>
    %28 = arith.addf %26, %27 : vector<2x256xf32>
    %29 = arith.negf %28 : vector<2x256xf32>
    %30 = math.exp %29 : vector<2x256xf32>
    %cst_7 = arith.constant 1.000000e+00 : f32
    %31 = vector.broadcast %cst_7 : f32 to vector<2x256xf32>
    %32 = arith.addf %31, %30 : vector<2x256xf32>
    %33 = arith.divf %31, %32 : vector<2x256xf32>
    %34 = math.tanh %28 : vector<2x256xf32>
    %35 = arith.select %11, %33, %34 : vector<2x256xi1>, vector<2x256xf32>
    %36 = vector.extract_strided_slice %35 {offsets = [0, 0], sizes = [2, 64], strides = [1, 1]} : vector<2x256xf32> to vector<2x64xf32>
    %37 = vector.extract_strided_slice %35 {offsets = [0, 64], sizes = [2, 64], strides = [1, 1]} : vector<2x256xf32> to vector<2x64xf32>
    %38 = vector.extract_strided_slice %35 {offsets = [0, 128], sizes = [2, 64], strides = [1, 1]} : vector<2x256xf32> to vector<2x64xf32>
    %39 = vector.extract_strided_slice %35 {offsets = [0, 192], sizes = [2, 64], strides = [1, 1]} : vector<2x256xf32> to vector<2x64xf32>
    %40 = arith.mulf %37, %23 : vector<2x64xf32>
    %41 = arith.mulf %36, %39 : vector<2x64xf32>
    %42 = arith.addf %40, %41 : vector<2x64xf32>
    %43 = math.tanh %42 : vector<2x64xf32>
    %44 = arith.mulf %38, %43 : vector<2x64xf32>
    %45 = vector.extract_strided_slice %7 {offsets = [4, 0], sizes = [2, 256], strides = [1, 1]} : vector<16x512xf32> to vector<2x256xf32>
    %cst_8 = arith.constant dense<0.000000e+00> : vector<2x256xf32>
    %46 = tpu.matmul %44, %8, %cst_8 {dimension_numbers = #tpu.dot_dimension_numbers<[1], [0], [0], [1], [0, 0, 1, 1], [], []>} : vector<2x64xf32>, vector<64x256xf32>, vector<2x256xf32> -> vector<2x256xf32>
    %47 = arith.addf %45, %46 : vector<2x256xf32>
    %48 = arith.negf %47 : vector<2x256xf32>
    %49 = math.exp %48 : vector<2x256xf32>
    %cst_9 = arith.constant 1.000000e+00 : f32
    %50 = vector.broadcast %cst_9 : f32 to vector<2x256xf32>
    %51 = arith.addf %50, %49 : vector<2x256xf32>
    %52 = arith.divf %50, %51 : vector<2x256xf32>
    %53 = math.tanh %47 : vector<2x256xf32>
    %54 = arith.select %11, %52, %53 : vector<2x256xi1>, vector<2x256xf32>
    %55 = vector.extract_strided_slice %54 {offsets = [0, 0], sizes = [2, 64], strides = [1, 1]} : vector<2x256xf32> to vector<2x64xf32>
    %56 = vector.extract_strided_slice %54 {offsets = [0, 64], sizes = [2, 64], strides = [1, 1]} : vector<2x256xf32> to vector<2x64xf32>
    %57 = vector.extract_strided_slice %54 {offsets = [0, 128], sizes = [2, 64], strides = [1, 1]} : vector<2x256xf32> to vector<2x64xf32>
    %58 = vector.extract_strided_slice %54 {offsets = [0, 192], sizes = [2, 64], strides = [1, 1]} : vector<2x256xf32> to vector<2x64xf32>
    %59 = arith.mulf %56, %42 : vector<2x64xf32>
    %60 = arith.mulf %55, %58 : vector<2x64xf32>
    %61 = arith.addf %59, %60 : vector<2x64xf32>
    %62 = math.tanh %61 : vector<2x64xf32>
    %63 = arith.mulf %57, %62 : vector<2x64xf32>
    %64 = vector.extract_strided_slice %7 {offsets = [6, 0], sizes = [2, 256], strides = [1, 1]} : vector<16x512xf32> to vector<2x256xf32>
    %cst_10 = arith.constant dense<0.000000e+00> : vector<2x256xf32>
    %65 = tpu.matmul %63, %8, %cst_10 {dimension_numbers = #tpu.dot_dimension_numbers<[1], [0], [0], [1], [0, 0, 1, 1], [], []>} : vector<2x64xf32>, vector<64x256xf32>, vector<2x256xf32> -> vector<2x256xf32>
    %66 = arith.addf %64, %65 : vector<2x256xf32>
    %67 = arith.negf %66 : vector<2x256xf32>
    %68 = math.exp %67 : vector<2x256xf32>
    %cst_11 = arith.constant 1.000000e+00 : f32
    %69 = vector.broadcast %cst_11 : f32 to vector<2x256xf32>
    %70 = arith.addf %69, %68 : vector<2x256xf32>
    %71 = arith.divf %69, %70 : vector<2x256xf32>
    %72 = math.tanh %66 : vector<2x256xf32>
    %73 = arith.select %11, %71, %72 : vector<2x256xi1>, vector<2x256xf32>
    %74 = vector.extract_strided_slice %73 {offsets = [0, 0], sizes = [2, 64], strides = [1, 1]} : vector<2x256xf32> to vector<2x64xf32>
    %75 = vector.extract_strided_slice %73 {offsets = [0, 64], sizes = [2, 64], strides = [1, 1]} : vector<2x256xf32> to vector<2x64xf32>
    %76 = vector.extract_strided_slice %73 {offsets = [0, 128], sizes = [2, 64], strides = [1, 1]} : vector<2x256xf32> to vector<2x64xf32>
    %77 = vector.extract_strided_slice %73 {offsets = [0, 192], sizes = [2, 64], strides = [1, 1]} : vector<2x256xf32> to vector<2x64xf32>
    %78 = arith.mulf %75, %61 : vector<2x64xf32>
    %79 = arith.mulf %74, %77 : vector<2x64xf32>
    %80 = arith.addf %78, %79 : vector<2x64xf32>
    %81 = math.tanh %80 : vector<2x64xf32>
    %82 = arith.mulf %76, %81 : vector<2x64xf32>
    %83 = vector.extract_strided_slice %7 {offsets = [8, 0], sizes = [2, 256], strides = [1, 1]} : vector<16x512xf32> to vector<2x256xf32>
    %cst_12 = arith.constant dense<0.000000e+00> : vector<2x256xf32>
    %84 = tpu.matmul %82, %8, %cst_12 {dimension_numbers = #tpu.dot_dimension_numbers<[1], [0], [0], [1], [0, 0, 1, 1], [], []>} : vector<2x64xf32>, vector<64x256xf32>, vector<2x256xf32> -> vector<2x256xf32>
    %85 = arith.addf %83, %84 : vector<2x256xf32>
    %86 = arith.negf %85 : vector<2x256xf32>
    %87 = math.exp %86 : vector<2x256xf32>
    %cst_13 = arith.constant 1.000000e+00 : f32
    %88 = vector.broadcast %cst_13 : f32 to vector<2x256xf32>
    %89 = arith.addf %88, %87 : vector<2x256xf32>
    %90 = arith.divf %88, %89 : vector<2x256xf32>
    %91 = math.tanh %85 : vector<2x256xf32>
    %92 = arith.select %11, %90, %91 : vector<2x256xi1>, vector<2x256xf32>
    %93 = vector.extract_strided_slice %92 {offsets = [0, 0], sizes = [2, 64], strides = [1, 1]} : vector<2x256xf32> to vector<2x64xf32>
    %94 = vector.extract_strided_slice %92 {offsets = [0, 64], sizes = [2, 64], strides = [1, 1]} : vector<2x256xf32> to vector<2x64xf32>
    %95 = vector.extract_strided_slice %92 {offsets = [0, 128], sizes = [2, 64], strides = [1, 1]} : vector<2x256xf32> to vector<2x64xf32>
    %96 = vector.extract_strided_slice %92 {offsets = [0, 192], sizes = [2, 64], strides = [1, 1]} : vector<2x256xf32> to vector<2x64xf32>
    %97 = arith.mulf %94, %80 : vector<2x64xf32>
    %98 = arith.mulf %93, %96 : vector<2x64xf32>
    %99 = arith.addf %97, %98 : vector<2x64xf32>
    %100 = math.tanh %99 : vector<2x64xf32>
    %101 = arith.mulf %95, %100 : vector<2x64xf32>
    %102 = vector.extract_strided_slice %7 {offsets = [10, 0], sizes = [2, 256], strides = [1, 1]} : vector<16x512xf32> to vector<2x256xf32>
    %cst_14 = arith.constant dense<0.000000e+00> : vector<2x256xf32>
    %103 = tpu.matmul %101, %8, %cst_14 {dimension_numbers = #tpu.dot_dimension_numbers<[1], [0], [0], [1], [0, 0, 1, 1], [], []>} : vector<2x64xf32>, vector<64x256xf32>, vector<2x256xf32> -> vector<2x256xf32>
    %104 = arith.addf %102, %103 : vector<2x256xf32>
    %105 = arith.negf %104 : vector<2x256xf32>
    %106 = math.exp %105 : vector<2x256xf32>
    %cst_15 = arith.constant 1.000000e+00 : f32
    %107 = vector.broadcast %cst_15 : f32 to vector<2x256xf32>
    %108 = arith.addf %107, %106 : vector<2x256xf32>
    %109 = arith.divf %107, %108 : vector<2x256xf32>
    %110 = math.tanh %104 : vector<2x256xf32>
    %111 = arith.select %11, %109, %110 : vector<2x256xi1>, vector<2x256xf32>
    %112 = vector.extract_strided_slice %111 {offsets = [0, 0], sizes = [2, 64], strides = [1, 1]} : vector<2x256xf32> to vector<2x64xf32>
    %113 = vector.extract_strided_slice %111 {offsets = [0, 64], sizes = [2, 64], strides = [1, 1]} : vector<2x256xf32> to vector<2x64xf32>
    %114 = vector.extract_strided_slice %111 {offsets = [0, 128], sizes = [2, 64], strides = [1, 1]} : vector<2x256xf32> to vector<2x64xf32>
    %115 = vector.extract_strided_slice %111 {offsets = [0, 192], sizes = [2, 64], strides = [1, 1]} : vector<2x256xf32> to vector<2x64xf32>
    %116 = arith.mulf %113, %99 : vector<2x64xf32>
    %117 = arith.mulf %112, %115 : vector<2x64xf32>
    %118 = arith.addf %116, %117 : vector<2x64xf32>
    %119 = math.tanh %118 : vector<2x64xf32>
    %120 = arith.mulf %114, %119 : vector<2x64xf32>
    %121 = vector.extract_strided_slice %7 {offsets = [12, 0], sizes = [2, 256], strides = [1, 1]} : vector<16x512xf32> to vector<2x256xf32>
    %cst_16 = arith.constant dense<0.000000e+00> : vector<2x256xf32>
    %122 = tpu.matmul %120, %8, %cst_16 {dimension_numbers = #tpu.dot_dimension_numbers<[1], [0], [0], [1], [0, 0, 1, 1], [], []>} : vector<2x64xf32>, vector<64x256xf32>, vector<2x256xf32> -> vector<2x256xf32>
    %123 = arith.addf %121, %122 : vector<2x256xf32>
    %124 = arith.negf %123 : vector<2x256xf32>
    %125 = math.exp %124 : vector<2x256xf32>
    %cst_17 = arith.constant 1.000000e+00 : f32
    %126 = vector.broadcast %cst_17 : f32 to vector<2x256xf32>
    %127 = arith.addf %126, %125 : vector<2x256xf32>
    %128 = arith.divf %126, %127 : vector<2x256xf32>
    %129 = math.tanh %123 : vector<2x256xf32>
    %130 = arith.select %11, %128, %129 : vector<2x256xi1>, vector<2x256xf32>
    %131 = vector.extract_strided_slice %130 {offsets = [0, 0], sizes = [2, 64], strides = [1, 1]} : vector<2x256xf32> to vector<2x64xf32>
    %132 = vector.extract_strided_slice %130 {offsets = [0, 64], sizes = [2, 64], strides = [1, 1]} : vector<2x256xf32> to vector<2x64xf32>
    %133 = vector.extract_strided_slice %130 {offsets = [0, 128], sizes = [2, 64], strides = [1, 1]} : vector<2x256xf32> to vector<2x64xf32>
    %134 = vector.extract_strided_slice %130 {offsets = [0, 192], sizes = [2, 64], strides = [1, 1]} : vector<2x256xf32> to vector<2x64xf32>
    %135 = arith.mulf %132, %118 : vector<2x64xf32>
    %136 = arith.mulf %131, %134 : vector<2x64xf32>
    %137 = arith.addf %135, %136 : vector<2x64xf32>
    %138 = math.tanh %137 : vector<2x64xf32>
    %139 = arith.mulf %133, %138 : vector<2x64xf32>
    %140 = vector.extract_strided_slice %7 {offsets = [14, 0], sizes = [2, 256], strides = [1, 1]} : vector<16x512xf32> to vector<2x256xf32>
    %cst_18 = arith.constant dense<0.000000e+00> : vector<2x256xf32>
    %141 = tpu.matmul %139, %8, %cst_18 {dimension_numbers = #tpu.dot_dimension_numbers<[1], [0], [0], [1], [0, 0, 1, 1], [], []>} : vector<2x64xf32>, vector<64x256xf32>, vector<2x256xf32> -> vector<2x256xf32>
    %142 = arith.addf %140, %141 : vector<2x256xf32>
    %143 = arith.negf %142 : vector<2x256xf32>
    %144 = math.exp %143 : vector<2x256xf32>
    %cst_19 = arith.constant 1.000000e+00 : f32
    %145 = vector.broadcast %cst_19 : f32 to vector<2x256xf32>
    %146 = arith.addf %145, %144 : vector<2x256xf32>
    %147 = arith.divf %145, %146 : vector<2x256xf32>
    %148 = math.tanh %142 : vector<2x256xf32>
    %149 = arith.select %11, %147, %148 : vector<2x256xi1>, vector<2x256xf32>
    %150 = vector.extract_strided_slice %149 {offsets = [0, 0], sizes = [2, 64], strides = [1, 1]} : vector<2x256xf32> to vector<2x64xf32>
    %151 = vector.extract_strided_slice %149 {offsets = [0, 64], sizes = [2, 64], strides = [1, 1]} : vector<2x256xf32> to vector<2x64xf32>
    %152 = vector.extract_strided_slice %149 {offsets = [0, 128], sizes = [2, 64], strides = [1, 1]} : vector<2x256xf32> to vector<2x64xf32>
    %153 = vector.extract_strided_slice %149 {offsets = [0, 192], sizes = [2, 64], strides = [1, 1]} : vector<2x256xf32> to vector<2x64xf32>
    %154 = arith.mulf %151, %137 : vector<2x64xf32>
    %155 = arith.mulf %150, %153 : vector<2x64xf32>
    %156 = arith.addf %154, %155 : vector<2x64xf32>
    %157 = math.tanh %156 : vector<2x64xf32>
    %158 = arith.mulf %152, %157 : vector<2x64xf32>
    %159 = vector.extract_strided_slice %7 {offsets = [14, 256], sizes = [2, 256], strides = [1, 1]} : vector<16x512xf32> to vector<2x256xf32>
    %160 = arith.negf %159 : vector<2x256xf32>
    %161 = math.exp %160 : vector<2x256xf32>
    %cst_20 = arith.constant 1.000000e+00 : f32
    %162 = vector.broadcast %cst_20 : f32 to vector<2x256xf32>
    %163 = arith.addf %162, %161 : vector<2x256xf32>
    %164 = arith.divf %162, %163 : vector<2x256xf32>
    %165 = math.tanh %159 : vector<2x256xf32>
    %166 = arith.select %11, %164, %165 : vector<2x256xi1>, vector<2x256xf32>
    %167 = vector.extract_strided_slice %166 {offsets = [0, 0], sizes = [2, 64], strides = [1, 1]} : vector<2x256xf32> to vector<2x64xf32>
    %168 = vector.extract_strided_slice %166 {offsets = [0, 128], sizes = [2, 64], strides = [1, 1]} : vector<2x256xf32> to vector<2x64xf32>
    %169 = vector.extract_strided_slice %166 {offsets = [0, 192], sizes = [2, 64], strides = [1, 1]} : vector<2x256xf32> to vector<2x64xf32>
    %170 = arith.mulf %167, %169 : vector<2x64xf32>
    %171 = math.tanh %170 : vector<2x64xf32>
    %172 = arith.mulf %168, %171 : vector<2x64xf32>
    %173 = tpu.concatenate %158, %172 in 1 : vector<2x64xf32>, vector<2x64xf32> -> vector<2x128xf32>
    %c0_21 = arith.constant 0 : index
    %c0_22 = arith.constant 0 : index
    %174 = vector.load %arg3[%c0_21, %c0_22] : memref<2x128xf32, #tpu.memory_space<vmem>>, vector<2x128xf32>
    tpu.vector_store %arg3[%c0_21, %c0_22], %173 {strides = array<i32>} : memref<2x128xf32, #tpu.memory_space<vmem>>, vector<2x128xf32>,
    return
  }
}

</mosaic_0001>

<bundles_post_ra>
// kernel: encoder_forward.1
= control target key start
LH: loop header
LB: loop body
LE: loop exit
PB: predicated region body
PF: predicated region fallthrough
CT: control target
= control target key end

     0   :  { %8 = vsyncpa [#allocation3], 0  ;;  %s1756_s0 = inlined_call_operand.vmem [shape: s32[16,1], index: 0, kind: input, shape index: {}]   ;;  %s1757_s1 = inlined_call_operand.hbm [shape: f32[32,512], index: 1, kind: input, shape index: {}]   ;;  %s1758_s2 = inlined_call_operand.hbm [shape: f32[64,256], index: 2, kind: input, shape index: {}]   ;;  %s1759_s3 = inlined_call_operand.hbm [shape: f32[2,128], index: 3, kind: output, shape index: {}]  }
   0x1   :  { %9 = vsyncpa [#allocation6], 0 }
   0x2   :  { %10 = vsyncpa [#allocation4], 0  ;;  %s1500_s12 = smov [#allocation2]   ;;  %s1428_s16 = scalar_lea.hbm %s1757_s1, 2048 }
   0x3   :  { %s18_s13 = sshll.u32 %s1500_s12, 4  ;;  %p1429_p0 = scmp.ne.s32.totalorder %s1757_s1, %s1428_s16  ;;  %s19_s13 = int_to_ptr.vmem [resolvable:$true] %s18_s13 }
   0x4   :  { %p1432_p1 = scmp.lt.u32.totalorder %s1428_s16, %s1757_s1 }
   0x6   :  { %p1434_p2 = pnand %p1432_p1, %p1429_p0 }
   0x8   :  { %1437 = shalt.err (!%p1434_p2)
}
   0x9   :  { %s1438_s21 = scalar_lea.vmem %s19_s13, 2048  ;;  %p1443_p4 = scmp.lt.s32.totalorder %s19_s13, %s19_s13 }
   0xa   :  { %p1439_p3 = scmp.ne.s32.totalorder %s19_s13, %s1438_s21  ;;  %p1444_p5 = scmp.lt.s32.totalorder %s1438_s21, %s1438_s21 }
   0xc   :  { %p1445_p6 = por %p1444_p5, %p1443_p4 }
   0xe   :  { %p1446_p7 = pnand %p1445_p6, %p1439_p3 }
  0x10   :  { %1449 = shalt.err (!%p1446_p7)
}
  0x11   :  { %s1501_s22 = smov 512   ;;  %s1502_s23 = smov 32  }
  0x12   :  { %24 = dma.hbm_to_vmem [thread:$0]  %s1757_s1, 2048, %s19_s13, [#allocation3], %s1501_s22, %s1501_s22, %s1502_s23  }
  0x13   :  { %s1503_s26 = smov [#allocation5]   ;;  %s1450_s30 = scalar_lea.hbm %s1758_s2, 2048 }
  0x14   :  { %s30_s27 = sshll.u32 %s1503_s26, 4  ;;  %p1451_p8 = scmp.ne.s32.totalorder %s1758_s2, %s1450_s30  ;;  %s31_s27 = int_to_ptr.vmem [resolvable:$true] %s30_s27 }
  0x15   :  { %p1454_p9 = scmp.lt.u32.totalorder %s1450_s30, %s1758_s2 }
  0x17   :  { %p1456_p10 = pnand %p1454_p9, %p1451_p8 }
  0x19   :  { %1459 = shalt.err (!%p1456_p10)
}
  0x1a   :  { %s1460_s8 = scalar_lea.vmem %s31_s27, 2048  ;;  %p1465_p12 = scmp.lt.s32.totalorder %s31_s27, %s31_s27 }
  0x1b   :  { %p1461_p11 = scmp.ne.s32.totalorder %s31_s27, %s1460_s8  ;;  %p1466_p13 = scmp.lt.s32.totalorder %s1460_s8, %s1460_s8 }
  0x1d   :  { %p1467_p0 = por %p1466_p13, %p1465_p12 }
  0x1f   :  { %p1468_p1 = pnand %p1467_p0, %p1461_p11 }
  0x21   :  { %1471 = shalt.err (!%p1468_p1)
}
  0x22   :  { %s1504_s1 = smov 256   ;;  %s1505_s9 = smov 16  }
  0x23   :  { %36 = dma.hbm_to_vmem [thread:$0]  %s1758_s2, 2048, %s31_s27, [#allocation6], %s1504_s1, %s1504_s1, %s1505_s9  }
  0x24   :  { %1494 = dma.done.wait [#allocation3], 2048  }
  0x25   :  { %1495 = vsyncadd [#allocation3], 4294965248 }
  0x26   :  { %1496 = dma.done.wait [#allocation6], 2048  }
  0x27   :  { %1497 = vsyncadd [#allocation6], 4294965248  ;;  %v1506_v0 = vmov 0   ;;  %v1507_v1 = vmov 0.0   ;;  %v43_v2 = vld [vmem:[%s1756_s0] sm:$0xff]  ;;  %v60_v3 = vld [vmem:[#allocation2 + $0x8] sm:$0xff]  ;;  %v45_v15 = vlaneseq }
  0x28   :  { %1318 = vset.pattern.permute.xlu0 %v1506_v0  ;;  %146 = vmatprep.mubr.f32.mxu1 %v1507_v1  ;;  %v64_v4 = vld [vmem:[#allocation2 + $0x28] sm:$0xff]  ;;  %v59_v6 = vld [vmem:[#allocation2] sm:$0xff]  ;;  %vm75_vm0 = vcmask 261120   ;;  %v237_v20 = vld [vmem:[#allocation5 + $0x18] sm:$0xff]  ;;  %s1508_s2 = smov 64   ;;  %vm276_vm3 = vcmask 523264  }
  0x29   :  { %344 = vmatprep.mubr.f32.mxu0 %v1507_v1  ;;  %1319 = vset.pattern.permute.xlu1 %v1506_v0  ;;  %v1180_v5 = vpack.c.bf16 %v64_v4, %v60_v3  ;;  %v63_v7 = vld [vmem:[#allocation2 + $0x20] sm:$0xff]  ;;  %v68_v8 = vld [vmem:[#allocation2 + $0x48] sm:$0xff]  ;;  %v1559_v16 = vand.u32 127, %v45_v15  ;;  %v236_v26 = vld [vmem:[#allocation5 + $0x10] sm:$0xff] }
  0x2a   :  { %48 = vperm.xlu0 %1318, %v43_v2   ;;  %v1182_v9 = vpack.c.bf16 %v63_v7, %v59_v6  ;;  %v72_v10 = vld [vmem:[#allocation2 + $0x68] sm:$0xff]  ;;  %v67_v11 = vld [vmem:[#allocation2 + $0x40] sm:$0xff]  ;;  %v241_v31 = vld [vmem:[#allocation5 + $0x38] sm:$0xff] }
  0x2b   :  { %v71_v12 = vld [vmem:[#allocation2 + $0x60] sm:$0xff]  ;;  %1181 = vmatprep.subr.bf16.mxu1 %v1180_v5  ;;  %v1184_v13 = vpack.c.bf16 %v72_v10, %v68_v8  ;;  %v235_v19 = vld [vmem:[#allocation5 + $0x8] sm:$0xff]  ;;  %v240_v34 = vld [vmem:[#allocation5 + $0x30] sm:$0xff]  ;;  %v1591_v44 = vadd.s32 128, %v1559_v16 }
  0x2c   :  { %1183 = vmatpush1.bf16.msra.mxu1 %v1182_v9  ;;  %v1186_v14 = vpack.c.bf16 %v71_v12, %v67_v11  ;;  %v1568_v21 = vpack.c.bf16 %v237_v20, %v235_v19  ;;  %v234_v25 = vld [vmem:[#allocation5] sm:$0xff]  ;;  %v239_v30 = vld [vmem:[#allocation5 + $0x28] sm:$0xff]  ;;  %v245_v37 = vld [vmem:[#allocation5 + $0x58] sm:$0xff] }
  0x2d   :  { %1185 = vmatprep.subr.bf16.mxu1 %v1184_v13  ;;  %v1576_v28 = vpack.c.bf16 %v236_v26, %v234_v25  ;;  %v1580_v32 = vpack.c.bf16 %v241_v31, %v239_v30  ;;  %v238_v33 = vld [vmem:[#allocation5 + $0x20] sm:$0xff]  ;;  %v243_v36 = vld [vmem:[#allocation5 + $0x48] sm:$0xff]  ;;  %v244_v40 = vld [vmem:[#allocation5 + $0x50] sm:$0xff]  ;;  %vm252_vm2 = vcmp.lt.s32.totalorder %v1591_v44, 192 }
  0x2e   :  { %1197 = vmatprep.subr.bf16.mxu0 %v1568_v21  ;;  %v1582_v35 = vpack.c.bf16 %v240_v34, %v238_v33  ;;  %v242_v38 = vld [vmem:[#allocation5 + $0x40] sm:$0xff]  ;;  %v1585_v39 = vpack.c.bf16 %v245_v37, %v243_v36  ;;  %v247_v41 = vld [vmem:[#allocation5 + $0x68] sm:$0xff]  ;;  %v249_v42 = vld [vmem:[#allocation5 + $0x78] sm:$0xff] }
  0x2f   :  { %1199 = vmatpush1.bf16.msra.mxu0 %v1576_v28  ;;  %v1588_v43 = vpack.c.bf16 %v244_v40, %v242_v38  ;;  %v1594_v45 = vpack.c.bf16 %v249_v42, %v247_v41  ;;  %v246_v46 = vld [vmem:[#allocation5 + $0x60] sm:$0xff]  ;;  %v248_v47 = vld [vmem:[#allocation5 + $0x70] sm:$0xff]  ;;  %v62_v6 = vld [vmem:[#allocation2 + $0x18] sm:$0xff] }
  0x30   :  { %1187 = vmatpush1.bf16.msra.mxu1 %v1186_v14  ;;  %1201 = vmatprep.subr.bf16.mxu0 %v1580_v32  ;;  %v1597_v48 = vpack.c.bf16 %v248_v47, %v246_v46  ;;  %v66_v7 = vld [vmem:[#allocation2 + $0x38] sm:$0xff]  ;;  %v61_v8 = vld [vmem:[#allocation2 + $0x10] sm:$0xff] }
  0x31   :  { %v1188_v9 = vpack.c.bf16 %v66_v7, %v62_v6  ;;  %v65_v10 = vld [vmem:[#allocation2 + $0x30] sm:$0xff]  ;;  %v70_v19 = vld [vmem:[#allocation2 + $0x58] sm:$0xff] }
  0x32   :  { %v1190_v11 = vpack.c.bf16 %v65_v10, %v61_v8  ;;  %v74_v20 = vld [vmem:[#allocation2 + $0x78] sm:$0xff]  ;;  %v69_v25 = vld [vmem:[#allocation2 + $0x50] sm:$0xff] }
  0x33   :  { %1203 = vmatpush1.bf16.msra.mxu0 %v1582_v35  ;;  %1189 = vmatprep.subr.bf16.mxu1 %v1188_v9  ;;  %v73_v26 = vld [vmem:[#allocation2 + $0x70] sm:$0xff] }
  0x34   :  { %1205 = vmatprep.subr.bf16.mxu0 %v1585_v39 }
  0x37   :  { %1207 = vmatpush1.bf16.msra.mxu0 %v1588_v43 }
  0x38   :  { %1209 = vmatprep.subr.bf16.mxu0 %v1594_v45 }
  0x3b   :  { %1211 = vmatpush1.bf16.msra.mxu0 %v1597_v48 }
  0x3c   :  { %1229 = vmatprep.subr.bf16.mxu0 %v1568_v21 }
  0xa9   :  { %v49_v17 = vpop.permute.xlu0 %48 }
  0xaa   :  { %vm53_vm1 = vcmp.eq.s32.totalorder %v49_v17, %v1559_v16  ;;  %v44_v17 = vld [vmem:[%s1756_s0 + $0x8] sm:$0xff]  ;;  %s1509_s0 = smov [#allocation7]  }
  0xab   :  { %v1563_v18 = vsel %vm53_vm1, 1.0, %v1507_v1  ;;  %s1139_s16 = sshll.u32 %s1509_s0, 4  ;;  %s1140_s16 = int_to_ptr.vmem [resolvable:$true] %s1139_s16 }
  0xac   :  { %1151 = vmatmul.mubr.msk.f32.vlgmr.msra.gmra.mrb[0].mxu1 %vm75_vm0, %v1563_v18  ;;  %s1472_s17 = scalar_lea.vmem %s1140_s16, 32  ;;  %p1477_p3 = scmp.lt.s32.totalorder %s1140_s16, %s1140_s16 }
  0xad   :  { %152 = vmatprep.mubr.f32.mxu1 %v1507_v1  ;;  %1191 = vmatpush1.bf16.msra.mxu1 %v1190_v11  ;;  %p1473_p2 = scmp.ne.s32.totalorder %s1140_s16, %s1472_s17  ;;  %p1478_p4 = scmp.lt.s32.totalorder %s1472_s17, %s1472_s17 }
  0xaf   :  { %p1479_p5 = por %p1478_p4, %p1477_p3 }
  0xb1   :  { %p1480_p6 = pnand %p1479_p5, %p1473_p2 }
 0x17f   :  { %v1571_v22 = vpop.f32.mrb[0].mxu1 }
 0x180   :  { %v1573_v23 = vpop.f32.mrb[1].mxu1  ;;  %v1155_v52 = vmul.f32 -1.442695, %v1571_v22 }
 0x181   :  { %v1156_v24 = vmul.f32 -1.442695, %v1573_v23 }
 0x183   :  { %1320 = vpow2.f32 %v1156_v24  ;;  %v1192_v24 = vpack.c.bf16 %v74_v20, %v70_v19 }
 0x184   :  { %1322 = vtanh.f32 %v1573_v23 }
 0x185   :  { %1193 = vmatprep.subr.bf16.mxu1 %v1192_v24 }
 0x18d   :  { %v1321_v27 = vpop.eup %1320 }
 0x18e   :  { %v260_v29 = vadd.f32 1.0, %v1321_v27  ;;  %v1323_v49 = vpop.eup %1322  ;;  %v1194_v27 = vpack.c.bf16 %v73_v26, %v69_v25 }
 0x190   :  { %1324 = vrcp.f32 %v260_v29  ;;  %1195 = vmatpush1.bf16.msra.mxu1 %v1194_v27 }
 0x191   :  { %1326 = vpow2.f32 %v1155_v52  ;;  %1213 = vmatprep.subr.bf16.mxu1 %v1568_v21 }
 0x19a   :  { %v1325_v50 = vpop.eup %1324 }
 0x19b   :  { %v268_v51 = vsel %vm252_vm2, %v1325_v50, %v1323_v49  ;;  %v1327_v53 = vpop.eup %1326 }
 0x19c   :  { %270 = vrot.lane.b32.xlu0 %v268_v51, %s1508_s2  ;;  %v259_v54 = vadd.f32 1.0, %v1327_v53 }
 0x19e   :  { %1328 = vrcp.f32 %v259_v54 }
 0x1a8   :  { %v1329_v55 = vpop.eup %1328 }
 0x20e   :  { %v271_v56 = vpop.permute.xlu0 %270 }
 0x20f   :  { %v273_v57 = vmul.f32 %v1329_v55, %v271_v56 }
 0x211   :  { %1330 = vtanh.f32 %v273_v57  ;;  %v376_v15 = vrot.slane %v273_v57, 6 }
 0x21b   :  { %v1331_v58 = vpop.eup %1330 }
 0x21c   :  { %v275_v59 = vmul.f32 %v1331_v58, %v268_v51 }
 0x21e   :  { %1157 = vmatmul.mubr.msk.f32.vlgmr.msra.gmra.mrb[0].mxu0 %vm276_vm3, %v275_v59 }
 0x21f   :  { %1231 = vmatpush1.bf16.msra.mxu0 %v1576_v28  ;;  %584 = vmatprep.mubr.f32.mxu0 %v1507_v1 }
 0x220   :  { %1233 = vmatprep.subr.bf16.mxu0 %v1580_v32 }
 0x223   :  { %1235 = vmatpush1.bf16.msra.mxu0 %v1582_v35 }
 0x224   :  { %1237 = vmatprep.subr.bf16.mxu0 %v1585_v39 }
 0x227   :  { %1239 = vmatpush1.bf16.msra.mxu0 %v1588_v43 }
 0x228   :  { %1241 = vmatprep.subr.bf16.mxu0 %v1594_v45 }
 0x22b   :  { %1243 = vmatpush1.bf16.msra.mxu0 %v1597_v48 }
 0x22c   :  { %1261 = vmatprep.subr.bf16.mxu0 %v1568_v21 }
 0x2f1   :  { %v346_v60 = vpop.f32.mrb[0].mxu0 }
 0x2f2   :  { %v353_v61 = vrot.slane %v346_v60, 6  ;;  %v348_v62 = vpop.f32.mrb[1].mxu0 }
 0x2f3   :  { %v354_v63 = vrot.slane %v348_v62, 6 }
 0x2f4   :  { %v357_v0 = vadd.f32 %v353_v61, %v1571_v22 }
 0x2f5   :  { %v358_v2 = vadd.f32 %v354_v63, %v1573_v23 }
 0x2f6   :  { %v1158_v29 = vmul.f32 -1.442695, %v357_v0 }
 0x2f7   :  { %v1159_v3 = vmul.f32 -1.442695, %v358_v2 }
 0x2f9   :  { %1332 = vpow2.f32 %v1159_v3 }
 0x2fa   :  { %1334 = vtanh.f32 %v358_v2 }
 0x303   :  { %v1333_v4 = vpop.eup %1332 }
 0x304   :  { %v366_v5 = vadd.f32 1.0, %v1333_v4  ;;  %v1335_v12 = vpop.eup %1334 }
 0x306   :  { %1336 = vrcp.f32 %v366_v5 }
 0x307   :  { %1338 = vpow2.f32 %v1158_v29 }
 0x310   :  { %v1337_v13 = vpop.eup %1336 }
 0x311   :  { %v374_v14 = vsel %vm252_vm2, %v1337_v13, %v1335_v12  ;;  %v1339_v30 = vpop.eup %1338 }
 0x312   :  { %382 = vrot.lane.b32.xlu1 %v374_v14, %s1508_s2  ;;  %v365_v31 = vadd.f32 1.0, %v1339_v30 }
 0x314   :  { %1340 = vrcp.f32 %v365_v31 }
 0x316   :  { %377 = vrot.lane.b32.xlu1 %v376_v15, %s1508_s2 }
 0x31a   :  { %51 = vperm.xlu1 %1319, %v44_v17  }
 0x31e   :  { %v1341_v33 = vpop.eup %1340 }
 0x384   :  { %v383_v34 = vpop.permute.xlu1 %382 }
 0x385   :  { %v385_v36 = vmul.f32 %v1341_v33, %v383_v34 }
 0x387   :  { %387 = vrot.lane.b32.xlu0 %v385_v36, %s1508_s2 }
 0x388   :  { %v378_v37 = vpop.permute.xlu1 %377 }
 0x389   :  { %v380_v38 = vmul.f32 %v1341_v33, %v378_v37 }
 0x399   :  { %v52_v40 = vpop.permute.xlu1 %51 }
 0x39a   :  { %vm54_vm4 = vcmp.eq.s32.totalorder %v52_v40, %v1559_v16 }
 0x39b   :  { %v1150_v41 = vsel %vm54_vm4, 1.0, %v1507_v1 }
 0x39c   :  { %1152 = vmatmul.mubr.msk.f32.gmra.mrb[2].mxu1 %vm75_vm0, %v1150_v41 }
 0x39d   :  { %223 = vmatprep.mubr.f32.mxu1 %v1507_v1 }
 0x3a0   :  { %1153 = vmatmul.mubr.msk.f32.vlgmr.msra.gmra.mrb[4].mxu1 %vm75_vm0, %v1563_v18 }
 0x3a1   :  { %227 = vmatprep.mubr.f32.mxu1 %v1507_v1  ;;  %1215 = vmatpush1.bf16.msra.mxu1 %v1576_v28 }
 0x3a2   :  { %1217 = vmatprep.subr.bf16.mxu1 %v1580_v32 }
 0x3a4   :  { %1154 = vmatmul.mubr.msk.f32.gmra.mrb[6].mxu1 %vm75_vm0, %v1150_v41 }
 0x3a5   :  { %1219 = vmatpush1.bf16.msra.mxu1 %v1582_v35  ;;  %465 = vmatprep.mubr.f32.mxu1 %v1507_v1 }
 0x3a6   :  { %1221 = vmatprep.subr.bf16.mxu1 %v1585_v39 }
 0x3a9   :  { %1223 = vmatpush1.bf16.msra.mxu1 %v1588_v43 }
 0x3aa   :  { %1225 = vmatprep.subr.bf16.mxu1 %v1594_v45 }
 0x3ad   :  { %1227 = vmatpush1.bf16.msra.mxu1 %v1597_v48 }
 0x3ae   :  { %1245 = vmatprep.subr.bf16.mxu1 %v1568_v21 }
 0x3f9   :  { %v388_v16 = vpop.permute.xlu0 %387 }
 0x3fa   :  { %v390_v18 = vadd.f32 %v388_v16, %v380_v38 }
 0x3fc   :  { %1342 = vtanh.f32 %v390_v18  ;;  %v497_v11 = vrot.slane %v390_v18, 6 }
 0x406   :  { %v1343_v42 = vpop.eup %1342 }
 0x407   :  { %393 = vrot.lane.b32.xlu0 %v1343_v42, %s1508_s2 }
 0x46f   :  { %v1646_v46 = vpop.f32.mrb[2].mxu1 }
 0x470   :  { %v1648_v47 = vpop.f32.mrb[3].mxu1 }
 0x473   :  { %v225_v49 = vpop.f32.mrb[4].mxu1 }
 0x474   :  { %v226_v50 = vpop.f32.mrb[5].mxu1 }
 0x477   :  { %v1650_v51 = vpop.f32.mrb[6].mxu1 }
 0x478   :  { %v1652_v52 = vpop.f32.mrb[7].mxu1 }
 0x479   :  { %v394_v53 = vpop.permute.xlu0 %393 }
 0x47a   :  { %v396_v54 = vmul.f32 %v394_v53, %v374_v14 }
 0x47c   :  { %v398_v55 = vrot.slane %v396_v54, 2 }
 0x47e   :  { %1160 = vmatmul.mubr.msk.f32.vlgmr.msra.gmra.mrb[8].mxu1 %vm276_vm3, %v398_v55 }
 0x47f   :  { %1247 = vmatpush1.bf16.msra.mxu1 %v1576_v28  ;;  %703 = vmatprep.mubr.f32.mxu1 %v1507_v1 }
 0x480   :  { %1249 = vmatprep.subr.bf16.mxu1 %v1580_v32 }
 0x483   :  { %1251 = vmatpush1.bf16.msra.mxu1 %v1582_v35 }
 0x484   :  { %1253 = vmatprep.subr.bf16.mxu1 %v1585_v39 }
 0x487   :  { %1255 = vmatpush1.bf16.msra.mxu1 %v1588_v43 }
 0x488   :  { %1257 = vmatprep.subr.bf16.mxu1 %v1594_v45 }
 0x48b   :  { %1259 = vmatpush1.bf16.msra.mxu1 %v1597_v48 }
 0x48c   :  { %1277 = vmatprep.subr.bf16.mxu1 %v1568_v21 }
 0x551   :  { %v467_v56 = vpop.f32.mrb[8].mxu1 }
 0x552   :  { %v474_v57 = vrot.slane %v467_v56, 4  ;;  %v469_v58 = vpop.f32.mrb[9].mxu1 }
 0x553   :  { %v475_v59 = vrot.slane %v469_v58, 4 }
 0x554   :  { %v478_v60 = vadd.f32 %v474_v57, %v1571_v22 }
 0x555   :  { %v479_v61 = vadd.f32 %v475_v59, %v1573_v23 }
 0x556   :  { %v1161_v5 = vmul.f32 -1.442695, %v478_v60 }
 0x557   :  { %v1162_v62 = vmul.f32 -1.442695, %v479_v61 }
 0x559   :  { %1344 = vpow2.f32 %v1162_v62 }
 0x55a   :  { %1346 = vtanh.f32 %v479_v61 }
 0x563   :  { %v1345_v63 = vpop.eup %1344 }
 0x564   :  { %v487_v0 = vadd.f32 1.0, %v1345_v63  ;;  %v1347_v2 = vpop.eup %1346 }
 0x566   :  { %1348 = vrcp.f32 %v487_v0 }
 0x567   :  { %1350 = vpow2.f32 %v1161_v5 }
 0x570   :  { %v1349_v3 = vpop.eup %1348 }
 0x571   :  { %v495_v4 = vsel %vm252_vm2, %v1349_v3, %v1347_v2  ;;  %v1351_v6 = vpop.eup %1350 }
 0x572   :  { %501 = vrot.lane.b32.xlu1 %v495_v4, %s1508_s2  ;;  %v486_v7 = vadd.f32 1.0, %v1351_v6 }
 0x574   :  { %1352 = vrcp.f32 %v486_v7 }
 0x57e   :  { %v1353_v8 = vpop.eup %1352 }
 0x57f   :  { %v499_v12 = vmul.f32 %v1353_v8, %v497_v11 }
 0x5e4   :  { %v502_v9 = vpop.permute.xlu1 %501 }
 0x5e5   :  { %v504_v10 = vmul.f32 %v1353_v8, %v502_v9 }
 0x5e7   :  { %506 = vrot.lane.b32.xlu0 %v504_v10, %s1508_s2 }
 0x659   :  { %v507_v13 = vpop.permute.xlu0 %506 }
 0x65a   :  { %v509_v14 = vadd.f32 %v507_v13, %v499_v12 }
 0x65c   :  { %1354 = vtanh.f32 %v509_v14  ;;  %v616_v18 = vrot.slane %v509_v14, 6 }
 0x666   :  { %v1355_v15 = vpop.eup %1354 }
 0x667   :  { %512 = vrot.lane.b32.xlu1 %v1355_v15, %s1508_s2 }
 0x6d9   :  { %v513_v17 = vpop.permute.xlu1 %512 }
 0x6da   :  { %v515_v19 = vmul.f32 %v513_v17, %v495_v4 }
 0x6dc   :  { %v517_v20 = vrot.slane %v515_v19, 4 }
 0x6de   :  { %1163 = vmatmul.mubr.msk.f32.vlgmr.msra.gmra.mrb[2].mxu0 %vm276_vm3, %v517_v20 }
 0x6df   :  { %1263 = vmatpush1.bf16.msra.mxu0 %v1576_v28  ;;  %815 = vmatprep.mubr.f32.mxu0 %v1507_v1 }
 0x6e0   :  { %1265 = vmatprep.subr.bf16.mxu0 %v1580_v32 }
 0x6e3   :  { %1267 = vmatpush1.bf16.msra.mxu0 %v1582_v35 }
 0x6e4   :  { %1269 = vmatprep.subr.bf16.mxu0 %v1585_v39 }
 0x6e7   :  { %1271 = vmatpush1.bf16.msra.mxu0 %v1588_v43 }
 0x6e8   :  { %1273 = vmatprep.subr.bf16.mxu0 %v1594_v45 }
 0x6eb   :  { %1275 = vmatpush1.bf16.msra.mxu0 %v1597_v48 }
 0x6ec   :  { %1293 = vmatprep.subr.bf16.mxu0 %v1568_v21 }
 0x7b1   :  { %v586_v24 = vpop.f32.mrb[2].mxu0 }
 0x7b2   :  { %v593_v25 = vrot.slane %v586_v24, 2  ;;  %v588_v26 = vpop.f32.mrb[3].mxu0 }
 0x7b3   :  { %v594_v27 = vrot.slane %v588_v26, 2 }
 0x7b4   :  { %v597_v29 = vadd.f32 %v593_v25, %v1571_v22 }
 0x7b5   :  { %v598_v30 = vadd.f32 %v594_v27, %v1573_v23 }
 0x7b6   :  { %v1164_v21 = vmul.f32 -1.442695, %v597_v29 }
 0x7b7   :  { %v1165_v31 = vmul.f32 -1.442695, %v598_v30 }
 0x7b9   :  { %1356 = vpow2.f32 %v1165_v31 }
 0x7ba   :  { %1358 = vtanh.f32 %v598_v30 }
 0x7c3   :  { %v1357_v33 = vpop.eup %1356 }
 0x7c4   :  { %v606_v34 = vadd.f32 1.0, %v1357_v33  ;;  %v1359_v36 = vpop.eup %1358 }
 0x7c6   :  { %1360 = vrcp.f32 %v606_v34 }
 0x7c7   :  { %1362 = vpow2.f32 %v1164_v21 }
 0x7d0   :  { %v1361_v37 = vpop.eup %1360 }
 0x7d1   :  { %v614_v38 = vsel %vm252_vm2, %v1361_v37, %v1359_v36  ;;  %v1363_v40 = vpop.eup %1362 }
 0x7d2   :  { %620 = vrot.lane.b32.xlu0 %v614_v38, %s1508_s2  ;;  %v605_v41 = vadd.f32 1.0, %v1363_v40 }
 0x7d4   :  { %1364 = vrcp.f32 %v605_v41 }
 0x7de   :  { %v1365_v22 = vpop.eup %1364 }
 0x7df   :  { %v618_v42 = vmul.f32 %v1365_v22, %v616_v18 }
 0x844   :  { %v621_v23 = vpop.permute.xlu0 %620 }
 0x845   :  { %v623_v16 = vmul.f32 %v1365_v22, %v621_v23 }
 0x847   :  { %625 = vrot.lane.b32.xlu1 %v623_v16, %s1508_s2 }
 0x8b9   :  { %v626_v49 = vpop.permute.xlu1 %625 }
 0x8ba   :  { %v628_v50 = vadd.f32 %v626_v49, %v618_v42 }
 0x8bc   :  { %1366 = vtanh.f32 %v628_v50  ;;  %v729_v10 = vrot.slane %v628_v50, 6 }
 0x8c6   :  { %v1367_v53 = vpop.eup %1366 }
 0x8c7   :  { %631 = vrot.lane.b32.xlu0 %v1367_v53, %s1508_s2 }
 0x939   :  { %v632_v54 = vpop.permute.xlu0 %631 }
 0x93a   :  { %v634_v55 = vmul.f32 %v632_v54, %v614_v38 }
 0x93c   :  { %v636_v56 = vrot.slane %v634_v55, 6 }
 0x93e   :  { %1166 = vmatmul.mubr.msk.f32.vlgmr.msra.gmra.mrb[10].mxu1 %vm276_vm3, %v636_v56 }
 0x93f   :  { %1279 = vmatpush1.bf16.msra.mxu1 %v1576_v28  ;;  %934 = vmatprep.mubr.f32.mxu1 %v1507_v1 }
 0x940   :  { %1281 = vmatprep.subr.bf16.mxu1 %v1580_v32 }
 0x943   :  { %1283 = vmatpush1.bf16.msra.mxu1 %v1582_v35 }
 0x944   :  { %1285 = vmatprep.subr.bf16.mxu1 %v1585_v39 }
 0x947   :  { %1287 = vmatpush1.bf16.msra.mxu1 %v1588_v43 }
 0x948   :  { %1289 = vmatprep.subr.bf16.mxu1 %v1594_v45 }
 0x94b   :  { %1291 = vmatpush1.bf16.msra.mxu1 %v1597_v48 }
 0xa11   :  { %v705_v57 = vpop.f32.mrb[10].mxu1 }
 0xa12   :  { %v710_v58 = vadd.f32 %v705_v57, %v1646_v46  ;;  %v707_v59 = vpop.f32.mrb[11].mxu1 }
 0xa13   :  { %v711_v60 = vadd.f32 %v707_v59, %v1648_v47 }
 0xa14   :  { %v1167_v4 = vmul.f32 -1.442695, %v710_v58 }
 0xa15   :  { %v1168_v61 = vmul.f32 -1.442695, %v711_v60 }
 0xa17   :  { %1368 = vpow2.f32 %v1168_v61 }
 0xa18   :  { %1370 = vtanh.f32 %v711_v60 }
 0xa21   :  { %v1369_v62 = vpop.eup %1368 }
 0xa22   :  { %v719_v63 = vadd.f32 1.0, %v1369_v62  ;;  %v1371_v0 = vpop.eup %1370 }
 0xa24   :  { %1372 = vrcp.f32 %v719_v63 }
 0xa25   :  { %1374 = vpow2.f32 %v1167_v4 }
 0xa2e   :  { %v1373_v2 = vpop.eup %1372 }
 0xa2f   :  { %v727_v3 = vsel %vm252_vm2, %v1373_v2, %v1371_v0  ;;  %v1375_v5 = vpop.eup %1374 }
 0xa30   :  { %733 = vrot.lane.b32.xlu1 %v727_v3, %s1508_s2  ;;  %v718_v6 = vadd.f32 1.0, %v1375_v5 }
 0xa32   :  { %1376 = vrcp.f32 %v718_v6 }
 0xa3c   :  { %v1377_v7 = vpop.eup %1376 }
 0xa3d   :  { %v731_v11 = vmul.f32 %v1377_v7, %v729_v10 }
 0xaa2   :  { %v734_v8 = vpop.permute.xlu1 %733 }
 0xaa3   :  { %v736_v9 = vmul.f32 %v1377_v7, %v734_v8 }
 0xaa5   :  { %738 = vrot.lane.b32.xlu0 %v736_v9, %s1508_s2 }
 0xb17   :  { %v739_v12 = vpop.permute.xlu0 %738 }
 0xb18   :  { %v741_v13 = vadd.f32 %v739_v12, %v731_v11 }
 0xb1a   :  { %1378 = vtanh.f32 %v741_v13  ;;  %v847_v34 = vrot.slane %v741_v13, 6  ;;  %v1179_v13 = vmul.f32 -1.442695, %v1652_v52 }
 0xb24   :  { %v1379_v14 = vpop.eup %1378 }
 0xb25   :  { %744 = vrot.lane.b32.xlu1 %v1379_v14, %s1508_s2 }
 0xb97   :  { %v745_v15 = vpop.permute.xlu1 %744 }
 0xb98   :  { %v747_v17 = vmul.f32 %v745_v15, %v727_v3 }
 0xb9a   :  { %1169 = vmatmul.mubr.msk.f32.vlgmr.msra.gmra.mrb[4].mxu0 %vm276_vm3, %v747_v17 }
 0xb9b   :  { %1295 = vmatpush1.bf16.msra.mxu0 %v1576_v28  ;;  %1053 = vmatprep.mubr.f32.mxu0 %v1507_v1 }
 0xb9c   :  { %1297 = vmatprep.subr.bf16.mxu0 %v1580_v32 }
 0xb9f   :  { %1299 = vmatpush1.bf16.msra.mxu0 %v1582_v35 }
 0xba0   :  { %1301 = vmatprep.subr.bf16.mxu0 %v1585_v39 }
 0xba3   :  { %1303 = vmatpush1.bf16.msra.mxu0 %v1588_v43 }
 0xba4   :  { %1305 = vmatprep.subr.bf16.mxu0 %v1594_v45 }
 0xba7   :  { %1307 = vmatpush1.bf16.msra.mxu0 %v1597_v48 }
 0xc6d   :  { %v817_v19 = vpop.f32.mrb[4].mxu0 }
 0xc6e   :  { %v824_v20 = vrot.slane %v817_v19, 6  ;;  %v819_v24 = vpop.f32.mrb[5].mxu0 }
 0xc6f   :  { %v825_v25 = vrot.slane %v819_v24, 6 }
 0xc70   :  { %v828_v28 = vadd.f32 %v824_v20, %v1646_v46 }
 0xc71   :  { %v829_v1 = vadd.f32 %v825_v25, %v1648_v47 }
 0xc72   :  { %v1170_v48 = vmul.f32 -1.442695, %v828_v28 }
 0xc73   :  { %v1171_v26 = vmul.f32 -1.442695, %v829_v1 }
 0xc75   :  { %1380 = vpow2.f32 %v1171_v26 }
 0xc76   :  { %1382 = vtanh.f32 %v829_v1 }
 0xc7f   :  { %v1381_v32 = vpop.eup %1380 }
 0xc80   :  { %v837_v35 = vadd.f32 1.0, %v1381_v32  ;;  %v1383_v39 = vpop.eup %1382 }
 0xc82   :  { %1384 = vrcp.f32 %v837_v35 }
 0xc83   :  { %1386 = vpow2.f32 %v1170_v48 }
 0xc8c   :  { %v1385_v43 = vpop.eup %1384 }
 0xc8d   :  { %v845_v45 = vsel %vm252_vm2, %v1385_v43, %v1383_v39  ;;  %v1387_v27 = vpop.eup %1386  ;;  %v1178_v43 = vmul.f32 -1.442695, %v1650_v51 }
 0xc8e   :  { %851 = vrot.lane.b32.xlu0 %v845_v45, %s1508_s2  ;;  %v836_v29 = vadd.f32 1.0, %v1387_v27 }
 0xc90   :  { %1388 = vrcp.f32 %v836_v29 }
 0xc9a   :  { %v1389_v30 = vpop.eup %1388 }
 0xc9b   :  { %v849_v36 = vmul.f32 %v1389_v30, %v847_v34 }
 0xd00   :  { %v852_v31 = vpop.permute.xlu0 %851 }
 0xd01   :  { %v854_v33 = vmul.f32 %v1389_v30, %v852_v31 }
 0xd03   :  { %856 = vrot.lane.b32.xlu1 %v854_v33, %s1508_s2 }
 0xd75   :  { %v857_v37 = vpop.permute.xlu1 %856 }
 0xd76   :  { %v859_v38 = vadd.f32 %v857_v37, %v849_v36 }
 0xd78   :  { %1390 = vtanh.f32 %v859_v38  ;;  %v966_v2 = vrot.slane %v859_v38, 6 }
 0xd82   :  { %v1391_v21 = vpop.eup %1390 }
 0xd83   :  { %862 = vrot.lane.b32.xlu0 %v1391_v21, %s1508_s2 }
 0xdf5   :  { %v863_v40 = vpop.permute.xlu0 %862 }
 0xdf6   :  { %v865_v41 = vmul.f32 %v863_v40, %v845_v45 }
 0xdf8   :  { %v867_v22 = vrot.slane %v865_v41, 2 }
 0xdfa   :  { %1172 = vmatmul.mubr.msk.f32.vlgmr.msra.gmra.mrb[12].mxu1 %vm276_vm3, %v867_v22 }
 0xecd   :  { %v936_v23 = vpop.f32.mrb[12].mxu1 }
 0xece   :  { %v943_v16 = vrot.slane %v936_v23, 4  ;;  %v938_v18 = vpop.f32.mrb[13].mxu1 }
 0xecf   :  { %v944_v42 = vrot.slane %v938_v18, 4 }
 0xed0   :  { %v947_v49 = vadd.f32 %v943_v16, %v1646_v46 }
 0xed1   :  { %v948_v50 = vadd.f32 %v944_v42, %v1648_v47 }
 0xed2   :  { %v1173_v59 = vmul.f32 -1.442695, %v947_v49 }
 0xed3   :  { %v1174_v53 = vmul.f32 -1.442695, %v948_v50 }
 0xed5   :  { %1392 = vpow2.f32 %v1174_v53 }
 0xed6   :  { %1394 = vtanh.f32 %v948_v50 }
 0xedf   :  { %v1393_v54 = vpop.eup %1392 }
 0xee0   :  { %v956_v55 = vadd.f32 1.0, %v1393_v54  ;;  %v1395_v56 = vpop.eup %1394 }
 0xee2   :  { %1396 = vrcp.f32 %v956_v55 }
 0xee3   :  { %1398 = vpow2.f32 %v1173_v59 }
 0xeec   :  { %v1397_v57 = vpop.eup %1396 }
 0xeed   :  { %v964_v58 = vsel %vm252_vm2, %v1397_v57, %v1395_v56  ;;  %v1399_v60 = vpop.eup %1398 }
 0xeee   :  { %970 = vrot.lane.b32.xlu1 %v964_v58, %s1508_s2  ;;  %v955_v61 = vadd.f32 1.0, %v1399_v60 }
 0xef0   :  { %1400 = vrcp.f32 %v955_v61 }
 0xefa   :  { %v1401_v62 = vpop.eup %1400 }
 0xefb   :  { %v968_v3 = vmul.f32 %v1401_v62, %v966_v2 }
 0xf60   :  { %v971_v63 = vpop.permute.xlu1 %970 }
 0xf61   :  { %v973_v0 = vmul.f32 %v1401_v62, %v971_v63 }
 0xf63   :  { %975 = vrot.lane.b32.xlu0 %v973_v0, %s1508_s2 }
 0xfd5   :  { %v976_v4 = vpop.permute.xlu0 %975 }
 0xfd6   :  { %v978_v5 = vadd.f32 %v976_v4, %v968_v3 }
 0xfd8   :  { %1402 = vtanh.f32 %v978_v5  ;;  %v1085_v51 = vrot.slane %v978_v5, 6 }
 0xfd9   :  { %1404 = vpow2.f32 %v1179_v13 }
 0xfe2   :  { %v1403_v6 = vpop.eup %1402 }
 0xfe3   :  { %981 = vrot.lane.b32.xlu1 %v1403_v6, %s1508_s2  ;;  %v1405_v20 = vpop.eup %1404 }
 0xfe4   :  { %v1111_v25 = vadd.f32 1.0, %v1405_v20 }
0x1055   :  { %v982_v7 = vpop.permute.xlu1 %981 }
0x1056   :  { %v984_v8 = vmul.f32 %v982_v7, %v964_v58 }
0x1058   :  { %v986_v9 = vrot.slane %v984_v8, 4 }
0x105a   :  { %1175 = vmatmul.mubr.msk.f32.vlgmr.msra.gmra.mrb[6].mxu0 %vm276_vm3, %v986_v9 }
0x112d   :  { %v1055_v10 = vpop.f32.mrb[6].mxu0 }
0x112e   :  { %v1062_v11 = vrot.slane %v1055_v10, 2  ;;  %v1057_v12 = vpop.f32.mrb[7].mxu0 }
0x112f   :  { %v1063_v14 = vrot.slane %v1057_v12, 2 }
0x1130   :  { %v1066_v15 = vadd.f32 %v1062_v11, %v1646_v46 }
0x1131   :  { %v1067_v17 = vadd.f32 %v1063_v14, %v1648_v47 }
0x1132   :  { %v1176_v39 = vmul.f32 -1.442695, %v1066_v15 }
0x1133   :  { %v1177_v19 = vmul.f32 -1.442695, %v1067_v17 }
0x1135   :  { %1406 = vpow2.f32 %v1177_v19 }
0x1136   :  { %1408 = vtanh.f32 %v1067_v17 }
0x113f   :  { %v1407_v24 = vpop.eup %1406 }
0x1140   :  { %v1075_v28 = vadd.f32 1.0, %v1407_v24  ;;  %v1409_v1 = vpop.eup %1408 }
0x1142   :  { %1410 = vrcp.f32 %v1075_v28 }
0x1143   :  { %1412 = vtanh.f32 %v1652_v52 }
0x1144   :  { %1414 = vrcp.f32 %v1111_v25 }
0x1145   :  { %1416 = vpow2.f32 %v1176_v39 }
0x1146   :  { %1418 = vpow2.f32 %v1178_v43 }
0x114c   :  { %v1411_v26 = vpop.eup %1410 }
0x114d   :  { %v1413_v32 = vpop.eup %1412  ;;  %v1083_v46 = vsel %vm252_vm2, %v1411_v26, %v1409_v1 }
0x114e   :  { %v1415_v35 = vpop.eup %1414  ;;  %1089 = vrot.lane.b32.xlu0 %v1083_v46, %s1508_s2 }
0x114f   :  { %v1119_v47 = vsel %vm252_vm2, %v1415_v35, %v1413_v32  ;;  %v1417_v52 = vpop.eup %1416 }
0x1150   :  { %v1074_v45 = vadd.f32 1.0, %v1417_v52  ;;  %v1419_v48 = vpop.eup %1418 }
0x1151   :  { %v1110_v27 = vadd.f32 1.0, %v1419_v48 }
0x1152   :  { %1121 = vrot.lane.b32.xlu0 %v1119_v47, %s1508_s2  ;;  %1420 = vrcp.f32 %v1074_v45 }
0x1153   :  { %1422 = vrcp.f32 %v1110_v27 }
0x115c   :  { %v1421_v29 = vpop.eup %1420 }
0x115d   :  { %v1423_v44 = vpop.eup %1422  ;;  %v1087_v38 = vmul.f32 %v1421_v29, %v1085_v51 }
0x11c0   :  { %v1090_v30 = vpop.permute.xlu0 %1089 }
0x11c1   :  { %v1092_v31 = vmul.f32 %v1421_v29, %v1090_v30 }
0x11c3   :  { %1094 = vrot.lane.b32.xlu1 %v1092_v31, %s1508_s2 }
0x11c4   :  { %v1122_v33 = vpop.permute.xlu0 %1121 }
0x11c5   :  { %v1124_v34 = vmul.f32 %v1423_v44, %v1122_v33 }
0x11c7   :  { %1424 = vtanh.f32 %v1124_v34 }
0x11d1   :  { %v1425_v36 = vpop.eup %1424 }
0x11d2   :  { %v1126_v37 = vmul.f32 %v1425_v36, %v1119_v47 }
0x11d4   :  { %1128 = vrot.lane.b32.xlu0 %v1126_v37, %s1508_s2 }
0x1235   :  { %v1095_v21 = vpop.permute.xlu1 %1094 }
0x1236   :  { %v1097_v40 = vadd.f32 %v1095_v21, %v1087_v38 }
0x1238   :  { %1426 = vtanh.f32 %v1097_v40 }
0x1242   :  { %v1427_v41 = vpop.eup %1426 }
0x1243   :  { %1100 = vrot.lane.b32.xlu1 %v1427_v41, %s1508_s2 }
0x1246   :  { %v1129_v16 = vpop.permute.xlu0 %1128 }
0x12b5   :  { %v1101_v22 = vpop.permute.xlu1 %1100 }
0x12b6   :  { %v1103_v23 = vmul.f32 %v1101_v22, %v1083_v46 }
0x12b8   :  { %v1131_v18 = vsel %vm276_vm3, %v1103_v23, %v1129_v16 }
0x12b9   :  { %1132 = vst [vmem:[#allocation7 - $0x6] sm:$0xc0] %v1131_v18 }
0x12ba   :  { %1483 = shalt.err (!%p1480_p6)
}
0x12bb   :  { %s1484_s20 = scalar_lea.hbm %s1759_s3, 32 }
0x12bc   :  { %p1485_p7 = scmp.ne.s32.totalorder %s1759_s3, %s1484_s20  ;;  %p1488_p8 = scmp.lt.u32.totalorder %s1484_s20, %s1759_s3 }
0x12be   :  { %p1490_p9 = pnand %p1488_p8, %p1485_p7 }
0x12c0   :  { %1493 = shalt.err (!%p1490_p9)
}
0x12c1   :  { %1142 = dma.vmem_to_hbm [thread:$0]  %s1140_s16, 32, %s1759_s3, [#allocation4]  }
0x12c2   :  { %1498 = dma.done.wait [#allocation4], 32  }
0x12c3   :  { %1499 = vsyncadd [#allocation4], 4294967264 }
0x12c4   :  { %1146 = vsyncpa [#allocation3], 1 }
0x12c5   :  { %1147 = vsyncpa [#allocation6], 1 }
0x12c6   :  { %1148 = vsyncpa [#allocation4], 1 }

</bundles_post_ra>
